<compile_context>
chip_gen: v7x
topology: tpu7x:2x2x1
jax: 0.10.0
libtpu: 0.0.40
codegen_flags: <defaults>
</compile_context>

<pallas_src>
import functools

import numpy as np
import jax
import jax.numpy as jnp
from jax import lax
from jax.experimental import pallas as pl
from jax.experimental.pallas import tpu as pltpu


# ----------------------------------------------------------------------------
# Deterministic "parameter" construction (mirrors __init__: default boxes).
# gen_default_boxes is synthesized SSD-style: (cx, cy, h, w), all positive.
# ----------------------------------------------------------------------------
def gen_default_boxes(shapes, scales, aspect_ratios):
    per_map = []
    for k, (fk, ars) in enumerate(zip(shapes, aspect_ratios)):
        sk, sk1 = float(scales[k]), float(scales[k + 1])
        anchors = [(sk, sk), (float(np.sqrt(sk * sk1)),) * 2]
        for ar in ars:
            r = float(np.sqrt(ar))
            anchors.append((sk * r, sk / r))
            anchors.append((sk / r, sk * r))
        rows = []
        for i in range(fk):
            for j in range(fk):
                cx = (j + 0.5) / fk
                cy = (i + 0.5) / fk
                for (h, w) in anchors:
                    rows.append([cx, cy, h, w])
        per_map.append(np.asarray(rows, dtype=np.float32))  # [fk*fk*A, 4]
    # equivalent to cat([d.flatten(1,3) for d in ...], 1).squeeze(0)
    return np.concatenate(per_map, axis=0)                  # [D, 4]


def _round_up(x, m):
    return ((x + m - 1) // m) * m


# ----------------------------------------------------------------------------
# Pallas kernel. grid = (B, n_d): batch axis "parallel", D-chunk axis
# "arbitrary" (reduction). One fused one-hot gather per D chunk, accumulated
# into an [8, P] VMEM scratch; encoding + smooth-L1 + per-batch mean on the
# last chunk.
# ----------------------------------------------------------------------------
def _ssd_local_kernel(pairs_ref, db_ref, boxes_ref, gt_ref, out_ref,
                      comb_ref, acc_ref, *, p_true):
    d = pl.program_id(1)
    n_d = pl.num_programs(1)

    Dt = db_ref.shape[1]
    P = pairs_ref.shape[1]
    G = gt_ref.shape[1]

    @pl.when(d == 0)
    def _():
        acc_ref[...] = jnp.zeros_like(acc_ref)

    # Chunk-local one-hot over the D contraction (gather via MXU matmul).
    # One-hot kept in f32 for exactness / portability (v7x MXU has no int mode;
    # bf16 would round gathered coords before the log/div).
    db_ind = pairs_ref[0:1, :]                     # [1, P] int32, global indices
    local = db_ind - d * Dt                        # chunk-local indices
    onehot_db = (lax.broadcasted_iota(jnp.int32, (Dt, P), 0) == local
                 ).astype(jnp.float32)             # [Dt, P]

    # Fused gather: rows 0-3 = default boxes, rows 4-7 = pred boxes for this
    # batch -> one full-8-sublane MXU operand, one pass over K = Dt.
    comb_ref[0:4, :] = db_ref[...]
    comb_ref[4:8, :] = boxes_ref[...]
    acc_ref[...] += jnp.dot(comb_ref[...], onehot_db,
                            preferred_element_type=jnp.float32)   # [8, P]

    @pl.when(d == n_d - 1)
    def _():
        # Small gt gather (K = G is tiny) done once, on the last chunk.
        gt_ind = pairs_ref[1:2, :]
        onehot_gt = (lax.broadcasted_iota(jnp.int32, (G, P), 0) == gt_ind
                     ).astype(jnp.float32)
        gt_sel = jnp.dot(gt_ref[...], onehot_gt,
                         preferred_element_type=jnp.float32)       # [4, P]

        fused = acc_ref[...]
        d0, d1, d2, d3 = (fused[i:i + 1, :] for i in range(4))
        p0, p1, p2, p3 = (fused[i:i + 1, :] for i in range(4, 8))
        g0, g1, g2, g3 = (gt_sel[i:i + 1, :] for i in range(4))

        # Target encoding, per coordinate row (no [4, P] concat materialized).
        t0 = (g0 - d0) / d3
        t1 = (g1 - d1) / d2
        t2 = jnp.log(g2 / d2)
        t3 = jnp.log(g3 / d3)

        def sl1(pred, tgt):
            diff = pred - tgt
            ad = jnp.abs(diff)
            return jnp.where(ad < 1.0, 0.5 * diff * diff, ad - 0.5)

        # Mask out lane-padded (fake) pairs; normalize by the true pair count.
        lane = lax.broadcasted_iota(jnp.int32, (1, P), 1)
        mask = (lane < p_true).astype(jnp.float32)

        total = (sl1(p0, t0) + sl1(p1, t1) + sl1(p2, t2) + sl1(p3, t3)) * mask
        loss_b = jnp.sum(total) * (1.0 / (4.0 * p_true))
        out_ref[...] = jnp.broadcast_to(loss_b, out_ref.shape).astype(out_ref.dtype)


def ssd_local_criterion(boxes_list, gt_boxes, pairs, default_boxes, *,
                        max_d_tile=1024):
    """boxes_list: list of [B, H, W, A, 4]; gt_boxes: [B, G, 4];
    pairs: [B, P, 2] int32; default_boxes: [D, 4]. Returns scalar loss."""
    B = gt_boxes.shape[0]
    # Glue: flatten(1,3) + cat along dim 1, then transpose to kernel layout.
    flat = jnp.concatenate(
        [b.reshape(b.shape[0], -1, 4) for b in boxes_list], axis=1)   # [B, D, 4]
    D = flat.shape[1]
    G = gt_boxes.shape[1]
    P = pairs.shape[1]

    # Lane-dense padding: P and D to 128-lane multiples, G to a sublane multiple.
    D_pad = _round_up(D, 128)
    d_tile = D_pad if D_pad <= max_d_tile else max_d_tile
    D_pad = _round_up(D_pad, d_tile)
    n_d = D_pad // d_tile
    P_pad = _round_up(P, 128)
    G_pad = _round_up(G, 8)

    boxes_t = jnp.transpose(flat, (0, 2, 1)).astype(jnp.float32)       # [B, 4, D]
    boxes_t = jnp.pad(boxes_t, ((0, 0), (0, 0), (0, D_pad - D)))
    gt_t = jnp.transpose(gt_boxes, (0, 2, 1)).astype(jnp.float32)      # [B, 4, G]
    gt_t = jnp.pad(gt_t, ((0, 0), (0, 0), (0, G_pad - G)), constant_values=1.0)
    db_t = jnp.transpose(default_boxes, (1, 0)).astype(jnp.float32)    # [4, D]
    db_t = jnp.pad(db_t, ((0, 0), (0, D_pad - D)), constant_values=1.0)
    pairs_t = jnp.transpose(pairs, (0, 2, 1)).astype(jnp.int32)        # [B, 2, P]
    # Padded pairs index (db=0, gt=0): valid entries, masked out of the loss.
    pairs_t = jnp.pad(pairs_t, ((0, 0), (0, 0), (0, P_pad - P)))

    kernel = functools.partial(_ssd_local_kernel, p_true=P)

    out = pl.pallas_call(
        kernel,
        out_shape=jax.ShapeDtypeStruct((B, 8, 128), jnp.float32),
        grid_spec=pltpu.PrefetchScalarGridSpec(
            num_scalar_prefetch=0,
            grid=(B, n_d),
            in_specs=[
                pl.BlockSpec((None, 2, P_pad), lambda b, d: (b, 0, 0)),    # pairs
                pl.BlockSpec((4, d_tile), lambda b, d: (0, d)),            # default boxes (D-tiled)
                pl.BlockSpec((None, 4, d_tile), lambda b, d: (b, 0, d)),   # pred boxes (D-tiled)
                pl.BlockSpec((None, 4, G_pad), lambda b, d: (b, 0, 0)),    # gt boxes
            ],
            out_specs=pl.BlockSpec((None, 8, 128), lambda b, d: (b, 0, 0)),
            scratch_shapes=[
                pltpu.VMEM((8, d_tile), jnp.float32),   # fused [db; pred] operand
                pltpu.VMEM((8, P_pad), jnp.float32),    # gather accumulator over D tiles
            ],
        ),
        compiler_params=pltpu.CompilerParams(
            dimension_semantics=("parallel", "arbitrary")),
    )(pairs_t, db_t, boxes_t, gt_t)

    # final: torch.stack(all_losses).mean()
    return jnp.mean(out[:, 0, 0])


# ----------------------------------------------------------------------------
# Pure-JAX reference (mirrors the PyTorch forward exactly).
# ----------------------------------------------------------------------------
def ssd_local_criterion_ref(boxes_list, gt_boxes, pairs, default_boxes):
    flat = jnp.concatenate(
        [b.reshape(b.shape[0], -1, 4) for b in boxes_list], axis=1)
    losses = []
    for b in range(gt_boxes.shape[0]):
        db_ind = pairs[b, :, 0]
        gt_ind = pairs[b, :, 1]
        db = default_boxes[db_ind]
        gt = gt_boxes[b][gt_ind]
        cx = (gt[:, 0] - db[:, 0]) / db[:, 3]
        cy = (gt[:, 1] - db[:, 1]) / db[:, 2]
        h = jnp.log(gt[:, 2] / db[:, 2])
        w = jnp.log(gt[:, 3] / db[:, 3])
        tgt = jnp.stack([cx, cy, h, w], axis=-1)
        sel = flat[b][db_ind]
        d = sel - tgt
        ad = jnp.abs(d)
        sl1 = jnp.where(ad < 1.0, 0.5 * d * d, ad - 0.5)
        losses.append(jnp.mean(sl1))
    return jnp.mean(jnp.stack(losses))


if __name__ == "__main__":
    # Small synthetic config (full SSD uses shapes [37,19,10,5,3,1]).
    shapes = [4, 2, 1]
    aspect_ratios = [[2], [2, 3], [2]]
    scale_min, scale_max = 0.2, 0.9
    one_step = (scale_max - scale_min) / 5
    scales = np.arange(scale_min, scale_max + one_step + 0.01, one_step,
                       dtype=np.float32)
    default_boxes = jnp.asarray(
        gen_default_boxes(shapes, scales, aspect_ratios))   # [D, 4], D = 92

    B, G, P = 2, 8, 64
    D = default_boxes.shape[0]
    anchors_per_map = [4, 6, 4]

    key = jax.random.PRNGKey(0)
    k_boxes, k_gt, k_db, k_gi = jax.random.split(key, 4)

    # Predicted box regression outputs, one per feature map: [B, H, W, A, 4].
    boxes_list = []
    kb = k_boxes
    for fk, A in zip(shapes, anchors_per_map):
        kb, sub = jax.random.split(kb)
        boxes_list.append(
            jax.random.normal(sub, (B, fk, fk, A, 4), dtype=jnp.float32) * 0.1)

    # Ground-truth boxes (cx, cy, h, w) with positive sizes.
    gt_boxes = jax.random.uniform(k_gt, (B, G, 4), dtype=jnp.float32,
                                  minval=0.1, maxval=0.9)

    # Matched (default_box_index, gt_index) pairs per batch element.
    # TODO(synk): PyTorch accepts variable-length pairs per image; here a fixed
    # P per batch element is used (lane-padded to 128 and masked in-kernel).
    db_ind = jax.random.randint(k_db, (B, P, 1), 0, D, dtype=jnp.int32)
    gt_ind = jax.random.randint(k_gi, (B, P, 1), 0, G, dtype=jnp.int32)
    pairs = jnp.concatenate([db_ind, gt_ind], axis=-1)       # [B, P, 2]

    loss = ssd_local_criterion(boxes_list, gt_boxes, pairs, default_boxes)
    loss = jax.block_until_ready(loss)

    ref = jax.block_until_ready(
        ssd_local_criterion_ref(boxes_list, gt_boxes, pairs, default_boxes))
    np.testing.assert_allclose(np.asarray(loss), np.asarray(ref),
                               rtol=1e-4, atol=1e-5)

    print("KERNEL_OK")
</pallas_src>

<mosaic_0001>
module attributes {stable_mosaic.version = 11 : i64} {
  func.func @_ssd_local_kernel(%arg0: i32, %arg1: i32, %arg2: memref<1x2x128xi32, #tpu.memory_space<vmem>>, %arg3: memref<4x128xf32, #tpu.memory_space<vmem>>, %arg4: memref<1x4x128xf32, #tpu.memory_space<vmem>>, %arg5: memref<1x4x8xf32, #tpu.memory_space<vmem>>, %arg6: memref<1x8x128xf32, #tpu.memory_space<vmem>>, %arg7: memref<8x128xf32, #tpu.memory_space<vmem>>, %arg8: memref<8x128xf32, #tpu.memory_space<vmem>>) attributes {dimension_semantics = [#tpu.dimension_semantics<parallel>, #tpu.dimension_semantics<arbitrary>], iteration_bounds = array<i64: 2, 1>, scalar_prefetch = 0 : i64, scratch_operands = 2 : i64, tpu.core_type = #tpu.core_type<tc>, window_params = [{transform_indices = @transform_0, window_bounds = array<i64: 1, 2, 128>}, {transform_indices = @transform_1, window_bounds = array<i64: 4, 128>}, {transform_indices = @transform_2, window_bounds = array<i64: 1, 4, 128>}, {transform_indices = @transform_3, window_bounds = array<i64: 1, 4, 8>}, {transform_indices = @transform_4, window_bounds = array<i64: 1, 8, 128>}]} {
    %c0_i32 = arith.constant 0 : i32
    %0 = arith.cmpi eq, %arg1, %c0_i32 : i32
    %1 = arith.extui %0 : i1 to i32
    %c0_i32_0 = arith.constant 0 : i32
    %2 = arith.cmpi ne, %1, %c0_i32_0 : i32
    scf.if %2 {
      %cst_19 = arith.constant 0.000000e+00 : f32
      %26 = vector.broadcast %cst_19 : f32 to vector<8x128xf32>
      %c0_20 = arith.constant 0 : index
      %c0_21 = arith.constant 0 : index
      %27 = vector.load %arg8[%c0_20, %c0_21] : memref<8x128xf32, #tpu.memory_space<vmem>>, vector<8x128xf32>
      tpu.vector_store %arg8[%c0_20, %c0_21], %26 {strides = array<i32>} : memref<8x128xf32, #tpu.memory_space<vmem>>, vector<8x128xf32>,
    } else {
    }
    %c0 = arith.constant 0 : index
    %c0_1 = arith.constant 0 : index
    %c0_2 = arith.constant 0 : index
    %3 = vector.load %arg2[%c0, %c0_1, %c0_2] : memref<1x2x128xi32, #tpu.memory_space<vmem>>, vector<1x1x128xi32>
    %4 = vector.shape_cast %3 : vector<1x1x128xi32> to vector<1x128xi32>
    %c128_i32 = arith.constant 128 : i32
    %5 = arith.muli %arg1, %c128_i32 : i32
    %6 = vector.broadcast %5 : i32 to vector<1x128xi32>
    %7 = arith.subi %4, %6 : vector<1x128xi32>
    %8 = tpu.iota {dimensions = array<i32: 0>} : vector<128x128xi32>
    %9 = vector.broadcast %7 : vector<1x128xi32> to vector<128x128xi32>
    %10 = arith.cmpi eq, %8, %9 : vector<128x128xi32>
    %11 = arith.extui %10 : vector<128x128xi1> to vector<128x128xi32>
    %12 = arith.sitofp %11 : vector<128x128xi32> to vector<128x128xf32>
    %c0_3 = arith.constant 0 : index
    %c0_4 = arith.constant 0 : index
    %13 = vector.load %arg3[%c0_3, %c0_4] : memref<4x128xf32, #tpu.memory_space<vmem>>, vector<4x128xf32>
    %c0_5 = arith.constant 0 : index
    %c0_6 = arith.constant 0 : index
    %14 = vector.load %arg7[%c0_5, %c0_6] : memref<8x128xf32, #tpu.memory_space<vmem>>, vector<4x128xf32>
    tpu.vector_store %arg7[%c0_5, %c0_6], %13 {strides = array<i32>} : memref<8x128xf32, #tpu.memory_space<vmem>>, vector<4x128xf32>,
    %c0_7 = arith.constant 0 : index
    %c0_8 = arith.constant 0 : index
    %c0_9 = arith.constant 0 : index
    %15 = vector.load %arg4[%c0_7, %c0_8, %c0_9] : memref<1x4x128xf32, #tpu.memory_space<vmem>>, vector<1x4x128xf32>
    %16 = vector.shape_cast %15 : vector<1x4x128xf32> to vector<4x128xf32>
    %c4 = arith.constant 4 : index
    %c0_10 = arith.constant 0 : index
    %17 = vector.load %arg7[%c4, %c0_10] : memref<8x128xf32, #tpu.memory_space<vmem>>, vector<4x128xf32>
    tpu.vector_store %arg7[%c4, %c0_10], %16 {strides = array<i32>} : memref<8x128xf32, #tpu.memory_space<vmem>>, vector<4x128xf32>,
    %c0_11 = arith.constant 0 : index
    %c0_12 = arith.constant 0 : index
    %18 = vector.load %arg8[%c0_11, %c0_12] : memref<8x128xf32, #tpu.memory_space<vmem>>, vector<8x128xf32>
    %c0_13 = arith.constant 0 : index
    %c0_14 = arith.constant 0 : index
    %19 = vector.load %arg7[%c0_13, %c0_14] : memref<8x128xf32, #tpu.memory_space<vmem>>, vector<8x128xf32>
    %cst = arith.constant dense<0.000000e+00> : vector<8x128xf32>
    %20 = tpu.matmul %19, %12, %cst {dimension_numbers = #tpu.dot_dimension_numbers<[1], [0], [0], [1], [0, 0, 1, 1], [], []>} : vector<8x128xf32>, vector<128x128xf32>, vector<8x128xf32> -> vector<8x128xf32>
    %21 = arith.addf %18, %20 : vector<8x128xf32>
    %c0_15 = arith.constant 0 : index
    %c0_16 = arith.constant 0 : index
    %22 = vector.load %arg8[%c0_15, %c0_16] : memref<8x128xf32, #tpu.memory_space<vmem>>, vector<8x128xf32>
    tpu.vector_store %arg8[%c0_15, %c0_16], %21 {strides = array<i32>} : memref<8x128xf32, #tpu.memory_space<vmem>>, vector<8x128xf32>,
    %c0_i32_17 = arith.constant 0 : i32
    %23 = arith.cmpi eq, %arg1, %c0_i32_17 : i32
    %24 = arith.extui %23 : i1 to i32
    %c0_i32_18 = arith.constant 0 : i32
    %25 = arith.cmpi ne, %24, %c0_i32_18 : i32
    scf.if %25 {
      %c0_19 = arith.constant 0 : index
      %c1 = arith.constant 1 : index
      %c0_20 = arith.constant 0 : index
      %26 = vector.load %arg2[%c0_19, %c1, %c0_20] : memref<1x2x128xi32, #tpu.memory_space<vmem>>, vector<1x1x128xi32>
      %27 = vector.shape_cast %26 : vector<1x1x128xi32> to vector<1x128xi32>
      %28 = tpu.iota {dimensions = array<i32: 0>} : vector<8x128xi32>
      %29 = vector.broadcast %27 : vector<1x128xi32> to vector<8x128xi32>
      %30 = arith.cmpi eq, %28, %29 : vector<8x128xi32>
      %31 = arith.extui %30 : vector<8x128xi1> to vector<8x128xi32>
      %32 = arith.sitofp %31 : vector<8x128xi32> to vector<8x128xf32>
      %c0_21 = arith.constant 0 : index
      %c0_22 = arith.constant 0 : index
      %c0_23 = arith.constant 0 : index
      %33 = vector.load %arg5[%c0_21, %c0_22, %c0_23] : memref<1x4x8xf32, #tpu.memory_space<vmem>>, vector<1x4x8xf32>
      %34 = vector.shape_cast %33 : vector<1x4x8xf32> to vector<4x8xf32>
      %cst_24 = arith.constant dense<0.000000e+00> : vector<4x128xf32>
      %35 = tpu.matmul %34, %32, %cst_24 {dimension_numbers = #tpu.dot_dimension_numbers<[1], [0], [0], [1], [0, 0, 1, 1], [], []>} : vector<4x8xf32>, vector<8x128xf32>, vector<4x128xf32> -> vector<4x128xf32>
      %c0_25 = arith.constant 0 : index
      %c0_26 = arith.constant 0 : index
      %36 = vector.load %arg8[%c0_25, %c0_26] : memref<8x128xf32, #tpu.memory_space<vmem>>, vector<8x128xf32>
      %37 = vector.extract_strided_slice %36 {offsets = [0, 0], sizes = [1, 128], strides = [1, 1]} : vector<8x128xf32> to vector<1x128xf32>
      %38 = vector.extract_strided_slice %36 {offsets = [1, 0], sizes = [1, 128], strides = [1, 1]} : vector<8x128xf32> to vector<1x128xf32>
      %39 = vector.extract_strided_slice %36 {offsets = [2, 0], sizes = [1, 128], strides = [1, 1]} : vector<8x128xf32> to vector<1x128xf32>
      %40 = vector.extract_strided_slice %36 {offsets = [3, 0], sizes = [1, 128], strides = [1, 1]} : vector<8x128xf32> to vector<1x128xf32>
      %41 = vector.extract_strided_slice %36 {offsets = [4, 0], sizes = [1, 128], strides = [1, 1]} : vector<8x128xf32> to vector<1x128xf32>
      %42 = vector.extract_strided_slice %36 {offsets = [5, 0], sizes = [1, 128], strides = [1, 1]} : vector<8x128xf32> to vector<1x128xf32>
      %43 = vector.extract_strided_slice %36 {offsets = [6, 0], sizes = [1, 128], strides = [1, 1]} : vector<8x128xf32> to vector<1x128xf32>
      %44 = vector.extract_strided_slice %36 {offsets = [7, 0], sizes = [1, 128], strides = [1, 1]} : vector<8x128xf32> to vector<1x128xf32>
      %45 = vector.extract_strided_slice %35 {offsets = [0, 0], sizes = [1, 128], strides = [1, 1]} : vector<4x128xf32> to vector<1x128xf32>
      %46 = vector.extract_strided_slice %35 {offsets = [1, 0], sizes = [1, 128], strides = [1, 1]} : vector<4x128xf32> to vector<1x128xf32>
      %47 = vector.extract_strided_slice %35 {offsets = [2, 0], sizes = [1, 128], strides = [1, 1]} : vector<4x128xf32> to vector<1x128xf32>
      %48 = vector.extract_strided_slice %35 {offsets = [3, 0], sizes = [1, 128], strides = [1, 1]} : vector<4x128xf32> to vector<1x128xf32>
      %49 = arith.subf %45, %37 : vector<1x128xf32>
      %50 = arith.divf %49, %40 : vector<1x128xf32>
      %51 = arith.subf %46, %38 : vector<1x128xf32>
      %52 = arith.divf %51, %39 : vector<1x128xf32>
      %53 = arith.divf %47, %39 : vector<1x128xf32>
      %54 = math.log %53 : vector<1x128xf32>
      %55 = arith.divf %48, %40 : vector<1x128xf32>
      %56 = math.log %55 : vector<1x128xf32>
      %57 = tpu.iota {dimensions = array<i32: 1>} : vector<1x128xi32>
      %c64_i32 = arith.constant 64 : i32
      %58 = vector.broadcast %c64_i32 : i32 to vector<1x128xi32>
      %59 = arith.cmpi slt, %57, %58 : vector<1x128xi32>
      %60 = arith.extui %59 : vector<1x128xi1> to vector<1x128xi32>
      %61 = arith.sitofp %60 : vector<1x128xi32> to vector<1x128xf32>
      %62 = arith.subf %41, %50 : vector<1x128xf32>
      %63 = math.absf %62 : vector<1x128xf32>
      %cst_27 = arith.constant 1.000000e+00 : f32
      %64 = vector.broadcast %cst_27 : f32 to vector<1x128xf32>
      %65 = arith.cmpf olt, %63, %64 : vector<1x128xf32>
      %cst_28 = arith.constant 5.000000e-01 : f32
      %66 = vector.broadcast %cst_28 : f32 to vector<1x128xf32>
      %67 = arith.mulf %66, %62 : vector<1x128xf32>
      %68 = arith.mulf %67, %62 : vector<1x128xf32>
      %cst_29 = arith.constant 5.000000e-01 : f32
      %69 = vector.broadcast %cst_29 : f32 to vector<1x128xf32>
      %70 = arith.subf %63, %69 : vector<1x128xf32>
      %71 = arith.select %65, %68, %70 : vector<1x128xi1>, vector<1x128xf32>
      %72 = arith.subf %42, %52 : vector<1x128xf32>
      %73 = math.absf %72 : vector<1x128xf32>
      %cst_30 = arith.constant 1.000000e+00 : f32
      %74 = vector.broadcast %cst_30 : f32 to vector<1x128xf32>
      %75 = arith.cmpf olt, %73, %74 : vector<1x128xf32>
      %cst_31 = arith.constant 5.000000e-01 : f32
      %76 = vector.broadcast %cst_31 : f32 to vector<1x128xf32>
      %77 = arith.mulf %76, %72 : vector<1x128xf32>
      %78 = arith.mulf %77, %72 : vector<1x128xf32>
      %cst_32 = arith.constant 5.000000e-01 : f32
      %79 = vector.broadcast %cst_32 : f32 to vector<1x128xf32>
      %80 = arith.subf %73, %79 : vector<1x128xf32>
      %81 = arith.select %75, %78, %80 : vector<1x128xi1>, vector<1x128xf32>
      %82 = arith.addf %71, %81 : vector<1x128xf32>
      %83 = arith.subf %43, %54 : vector<1x128xf32>
      %84 = math.absf %83 : vector<1x128xf32>
      %cst_33 = arith.constant 1.000000e+00 : f32
      %85 = vector.broadcast %cst_33 : f32 to vector<1x128xf32>
      %86 = arith.cmpf olt, %84, %85 : vector<1x128xf32>
      %cst_34 = arith.constant 5.000000e-01 : f32
      %87 = vector.broadcast %cst_34 : f32 to vector<1x128xf32>
      %88 = arith.mulf %87, %83 : vector<1x128xf32>
      %89 = arith.mulf %88, %83 : vector<1x128xf32>
      %cst_35 = arith.constant 5.000000e-01 : f32
      %90 = vector.broadcast %cst_35 : f32 to vector<1x128xf32>
      %91 = arith.subf %84, %90 : vector<1x128xf32>
      %92 = arith.select %86, %89, %91 : vector<1x128xi1>, vector<1x128xf32>
      %93 = arith.addf %82, %92 : vector<1x128xf32>
      %94 = arith.subf %44, %56 : vector<1x128xf32>
      %95 = math.absf %94 : vector<1x128xf32>
      %cst_36 = arith.constant 1.000000e+00 : f32
      %96 = vector.broadcast %cst_36 : f32 to vector<1x128xf32>
      %97 = arith.cmpf olt, %95, %96 : vector<1x128xf32>
      %cst_37 = arith.constant 5.000000e-01 : f32
      %98 = vector.broadcast %cst_37 : f32 to vector<1x128xf32>
      %99 = arith.mulf %98, %94 : vector<1x128xf32>
      %100 = arith.mulf %99, %94 : vector<1x128xf32>
      %cst_38 = arith.constant 5.000000e-01 : f32
      %101 = vector.broadcast %cst_38 : f32 to vector<1x128xf32>
      %102 = arith.subf %95, %101 : vector<1x128xf32>
      %103 = arith.select %97, %100, %102 : vector<1x128xi1>, vector<1x128xf32>
      %104 = arith.addf %93, %103 : vector<1x128xf32>
      %105 = arith.mulf %104, %61 : vector<1x128xf32>
      %106 = vector.shape_cast %105 : vector<1x128xf32> to vector<1x1x128xf32>
      %cst_39 = arith.constant dense<0.000000e+00> : vector<1xf32>
      %107 = vector.multi_reduction <add>, %106, %cst_39 [1, 2] : vector<1x1x128xf32> to vector<1xf32>
      %108 = vector.shape_cast %107 : vector<1xf32> to vector<1x1x1xf32>
      %109 = vector.extract %108[0, 0, 0] : f32 from vector<1x1x1xf32>
      %cst_40 = arith.constant 3.906250e-03 : f32
      %110 = arith.mulf %109, %cst_40 : f32
      %111 = vector.broadcast %110 : f32 to vector<8x128xf32>
      %c0_41 = arith.constant 0 : index
      %c0_42 = arith.constant 0 : index
      %c0_43 = arith.constant 0 : index
      %112 = vector.load %arg6[%c0_41, %c0_42, %c0_43] : memref<1x8x128xf32, #tpu.memory_space<vmem>>, vector<1x8x128xf32>
      %113 = vector.shape_cast %112 : vector<1x8x128xf32> to vector<8x128xf32>
      %114 = vector.shape_cast %111 : vector<8x128xf32> to vector<1x8x128xf32>
      tpu.vector_store %arg6[%c0_41, %c0_42, %c0_43], %114 {strides = array<i32>} : memref<1x8x128xf32, #tpu.memory_space<vmem>>, vector<1x8x128xf32>,
    } else {
    }
    return
  }
  func.func @transform_0(%arg0: i32, %arg1: i32) -> (i32, i32, i32) {
    %c0_i32 = arith.constant 0 : i32
    %c0_i32_0 = arith.constant 0 : i32
    %c0_i32_1 = arith.constant 0 : i32
    return %arg0, %c0_i32, %c0_i32_0 : i32, i32, i32
  }
  func.func @transform_1(%arg0: i32, %arg1: i32) -> (i32, i32) {
    %c0_i32 = arith.constant 0 : i32
    %c0_i32_0 = arith.constant 0 : i32
    return %c0_i32, %arg1 : i32, i32
  }
  func.func @transform_2(%arg0: i32, %arg1: i32) -> (i32, i32, i32) {
    %c0_i32 = arith.constant 0 : i32
    %c0_i32_0 = arith.constant 0 : i32
    return %arg0, %c0_i32, %arg1 : i32, i32, i32
  }
  func.func @transform_3(%arg0: i32, %arg1: i32) -> (i32, i32, i32) {
    %c0_i32 = arith.constant 0 : i32
    %c0_i32_0 = arith.constant 0 : i32
    %c0_i32_1 = arith.constant 0 : i32
    return %arg0, %c0_i32, %c0_i32_0 : i32, i32, i32
  }
  func.func @transform_4(%arg0: i32, %arg1: i32) -> (i32, i32, i32) {
    %c0_i32 = arith.constant 0 : i32
    %c0_i32_0 = arith.constant 0 : i32
    %c0_i32_1 = arith.constant 0 : i32
    return %arg0, %c0_i32, %c0_i32_0 : i32, i32, i32
  }
}

</mosaic_0001>

<bundles_post_ra>
// kernel: tpu_custom_call.1
= control target key start
LH: loop header
LB: loop body
LE: loop exit
PB: predicated region body
PF: predicated region fallthrough
CT: control target
= control target key end

     0   :  { %s1503_s0 = inlined_call_operand.hbm [shape: s32[2,2,128], index: 0, kind: input, shape index: {}]   ;;  %s1504_s1 = inlined_call_operand.hbm [shape: f32[4,128], index: 1, kind: input, shape index: {}]   ;;  %s1505_s2 = inlined_call_operand.hbm [shape: f32[2,4,128], index: 2, kind: input, shape index: {}]   ;;  %s1506_s3 = inlined_call_operand.vmem [shape: f32[2,4,8], index: 3, kind: input, shape index: {}]   ;;  %s1507_s4 = inlined_call_operand.hbm [shape: f32[2,8,128], index: 4, kind: output, shape index: {}]  }
   0x1   :  { %1513 = sst [smem:[#allocation15_spill]] %s1503_s0 }
   0x2   :  { %1514 = sst [smem:[#allocation16_spill]] %s1505_s2 }
   0x3   :  { %9 = vsyncpa [#allocation5], 0 }
   0x4   :  { %11 = vsyncpa [#allocation5 + $0x1], 0 }
   0x5   :  { %12 = vsyncpa [#allocation8], 0 }
   0x6   :  { %13 = vsyncpa [#allocation6], 0 }
   0x7   :  { %15 = vsyncpa [#allocation6 + $0x1], 0  ;;  %s1207_s15 = smov 0   ;;  %s1209_s16 = smov 0  }
   0x8   :  { %s1211_s17 = smov 0   ;;  %s1213_s18 = smov 0  }
   0x9   :  { %s1215_s19 = smov 0   ;;  %s1217_s20 = smov 0  }
   0xa LB: > { %s33_s21 = sadd.s32 1, %s1167_s19  ;;  %s40_s22 = sadd.s32 1, %s1159_s17  ;;  %s1171_s20 = sphi %s1217_s20, %s21_s20   ;;  %s1167_s19 = sphi %s1215_s19, %s1535_s19   ;;  %s1163_s18 = sphi %s1213_s18, %s1534_s18   ;;  %s1159_s17 = sphi %s1211_s17, %s1533_s17   ;;  %s1155_s16 = sphi %s1209_s16, %s1532_s16   ;;  %s1151_s15 = sphi %s1207_s15, %s1531_s15  }
   0xb   : > { %p35_p0 = scmp.ge.s32.totalorder %s33_s21, 2  ;;  %p47_p1 = scmp.ne.s32.totalorder %s1159_s17, %s1155_s16 }
   0xc   : > { %p48_p2 = scmp.eq.s32.totalorder %s1171_s20, 0  ;;  %p928_p5 = scmp.lt.s32.totalorder %s1171_s20, 2 }
   0xd   : > { %s1537_s21 = smov (%p35_p0, %s33_s21), 0  ;;  %s196_s24 = sand.u32 1, %s1171_s20  }
   0xe   : > { %p49_p4 = por %p48_p2, %p47_p1  ;;  %s37_s23 = ssub.s32 %s1167_s19, %s1537_s21 }
   0xf   : > { %p38_p6 = scmp.eq.s32.totalorder %s37_s23, 0  ;;  %s198_s25 = sand.u32 1, %s1159_s17  }
  0x10   : > { %s763_s26 = sshll.u32 %s1167_s19, 5  ;;  %s762_s28 = sshll.u32 %s198_s25, 1 }
  0x11   : > { %s1255_s27 = scalar_select %p38_p6, %s1159_s17, %s40_s22  }
  0x12   : > { %s1515_s0 = sld [smem:[#allocation15_spill]]  ;;  %p1262_p7 = pnand %p928_p5, %p49_p4 }
  0x13   : > { %s200_s7 = scalar_lea.vmem [#allocation4], %s762_s28  ;;  %s1266_s9 = sshll.u32 %s198_s25, 2 }
  0x14   : > { %s207_s8 = sshll.u32 %s200_s7, 4  ;;  %s1270_s10 = scalar_lea.sflag [#allocation5], %s196_s24  ;;  %s1268_s8 = int_to_ptr.vmem [resolvable:$true] %s207_s8 }
  0x15   : > { %p995_p9 = pneg %p1262_p7 }
  0x18   : > { %s1260_s5 = scalar_lea.hbm %s1515_s0, %s763_s26  ;;  %s998_s14 = scalar_lea.hbm %s1515_s0, 64 }
  0x19   : > { %s993_s11 = scalar_lea.hbm %s1260_s5, 32  ;;  %p999_p12 = scmp.lt.u32.totalorder %s1260_s5, %s1515_s0 }
  0x1a   : > { %p994_p8 = scmp.ne.s32.totalorder %s1260_s5, %s993_s11  ;;  %p1000_p13 = scmp.lt.u32.totalorder %s998_s14, %s993_s11 }
  0x1b   : > { %p1002_p2 = scmp.lt.u32.totalorder %s993_s11, %s1260_s5 }
  0x1c   : > { %p996_p10 = pnand %p995_p9, %p994_p8  ;;  %p1001_p0 = por %p1000_p13, %p999_p12 }
  0x1e   : > { %p997_p11 = pneg %p996_p10  ;;  %p1003_p4 = por %p1002_p2, %p1001_p0 }
  0x20   : > { %p1004_p5 = pnand %p1003_p4, %p997_p11 }
  0x22   : > { %1007 = shalt.err (!%p1004_p5)
}
  0x23   : > { %s1008_s24 = scalar_lea.vmem %s1268_s8, 32  ;;  %s1173_s25 = smov [#allocation4]  }
  0x24   : > { %p1009_p6 = scmp.ne.s32.totalorder %s1268_s8, %s1008_s24  ;;  %s1013_s26 = sshll.u32 %s1173_s25, 4  ;;  %s1014_s26 = int_to_ptr.vmem [resolvable:$false] %s1013_s26 }
  0x25   : > { %s1015_s28 = scalar_lea.vmem %s1014_s26, 64  ;;  %p1016_p3 = scmp.lt.s32.totalorder %s1268_s8, %s1014_s26 }
  0x26   : > { %p1011_p8 = pnand %p1009_p6, %p995_p9  ;;  %p1017_p12 = scmp.lt.s32.totalorder %s1015_s28, %s1008_s24 }
  0x28   : > { %p1012_p10 = pneg %p1011_p8  ;;  %p1018_p13 = por %p1017_p12, %p1016_p3 }
  0x2a   : > { %p1019_p0 = pnand %p1018_p13, %p1012_p10 }
  0x2c   : > { %1022 = shalt.err (!%p1019_p0)
}
  0x2d   : > { %919 = dma.hbm_to_vmem [thread:$0]  (!%p1262_p7), %s1260_s5, 32, %s1268_s8, %s1270_s10  }
  0x2e   : > { %s1299_s29 = sadd.s32 4294967295, %s1171_s20   ;;  %s758_s30 = sadd.s32 4294967294, %s1171_s20  }
  0x2f   : > { %p53_p3 = scmp.ne.s32.totalorder %s1155_s16, %s1151_s15  ;;  %p1508_p11 = scmp.eq.s32.totalorder %s1299_s29, 0 }
  0x30   : > { %p157_p2 = scmp.eq.s32.totalorder %s1299_s29, 1  ;;  %p163_p4 = scmp.eq.s32.totalorder %s758_s30, 1 }
  0x31   : > { %p1308_p5 = por %p1508_p11, %p53_p3  ;;  %p759_p6 = scmp.ge.s32.totalorder %s1171_s20, 1 }
  0x32   : > { %p1316_p8 = por %p157_p2, %p47_p1  ;;  %p1320_p10 = por %p163_p4, %p53_p3 }
  0x33   : > { %s1517_s7 = scalar_select %p1308_p5, 1, 0 }
  0x34   : > { %s1518_s5 = scalar_select %p1316_p8, 1, 0 }
  0x35   : > { %s1519_s8 = scalar_select %p1320_p10, 1, 0 }
  0x36   : > { %p170_p12 = scmp.lt.s32.totalorder %s1171_s20, 3  ;;  %s1174_s12 = smov [#allocation7]  }
  0x37   : > { %s185_s13 = sshll.u32 %s1174_s12, 4  ;;  %s765_s14 = sshll.u32 %s1167_s19, 6  ;;  %s1337_s13 = int_to_ptr.vmem [resolvable:$true] %s185_s13 }
  0x38   : > { %p1325_p13 = pnand %p759_p6, %p170_p12  ;;  %s1521_s2 = sld [smem:[#allocation16_spill]] }
  0x39   : > { %s218_s25 = scalar_lea.vmem [#allocation9], %s1266_s9 }
  0x3a   : > { %s1520_s11 = scalar_select %p1325_p13, 1, 0 }
  0x3b   : > { %p912_p0 = pneg %p1325_p13  ;;  %s226_s26 = sshll.u32 %s218_s25, 4  ;;  %s227_s26 = int_to_ptr.vmem [resolvable:$true] %s226_s26 }
  0x3d   : > { %p1342_p1 = pnand %p912_p0, %p1508_p11 }
  0x3e   : > { %s1335_s24 = scalar_lea.hbm %s1521_s2, %s765_s14  ;;  %s1028_s22 = scalar_lea.hbm %s1521_s2, 128 }
  0x3f   : > { %s1522_s28 = scalar_select %p1342_p1, 1, 0 }
  0x40   : > { %s1023_s30 = scalar_lea.hbm %s1335_s24, 64  ;;  %p1029_p6 = scmp.lt.u32.totalorder %s1335_s24, %s1521_s2 }
  0x41   : > { %p1024_p3 = scmp.ne.s32.totalorder %s1335_s24, %s1023_s30  ;;  %p1030_p12 = scmp.lt.u32.totalorder %s1028_s22, %s1023_s30 }
  0x42   : > { %p1032_p11 = scmp.lt.u32.totalorder %s1023_s30, %s1335_s24 }
  0x43   : > { %p1026_p2 = pnand %p1024_p3, %p995_p9  ;;  %p1031_p0 = por %p1030_p12, %p1029_p6 }
  0x45   : > { %p1027_p4 = pneg %p1026_p2  ;;  %p1033_p10 = por %p1032_p11, %p1031_p0 }
  0x47   : > { %p1034_p8 = pnand %p1033_p10, %p1027_p4 }
  0x49   : > { %1037 = shalt.err (!%p1034_p8)
}
  0x4a   : > { %s1038_s9 = scalar_lea.vmem %s227_s26, 64  ;;  %s1175_s25 = smov [#allocation9]  }
  0x4b   : > { %p1039_p5 = scmp.ne.s32.totalorder %s227_s26, %s1038_s9  ;;  %s1043_s12 = sshll.u32 %s1175_s25, 4  ;;  %s1044_s12 = int_to_ptr.vmem [resolvable:$false] %s1043_s12 }
  0x4c   : > { %s1045_s14 = scalar_lea.vmem %s1044_s12, 128  ;;  %p1046_p13 = scmp.lt.s32.totalorder %s227_s26, %s1044_s12 }
  0x4d   : > { %p1041_p3 = pnand %p1039_p5, %p995_p9  ;;  %p1047_p1 = scmp.lt.s32.totalorder %s1045_s14, %s1038_s9 }
  0x4f   : > { %p1042_p2 = pneg %p1041_p3  ;;  %p1048_p6 = por %p1047_p1, %p1046_p13 }
  0x51   : > { %p1049_p12 = pnand %p1048_p6, %p1042_p2 }
  0x53   : > { %1052 = shalt.err (!%p1049_p12)
}
  0x54   : > { %922 = dma.hbm_to_vmem [thread:$0]  (!%p1262_p7), %s1335_s24, 64, %s227_s26, %s1270_s10  }
  0x55   : > { %s1053_s22 = scalar_lea.hbm %s1504_s1, 64  ;;  %p1523_p11 = scmp.ne.s32.totalorder %s1522_s28, 0 }
  0x56   : > { %p1054_p9 = scmp.ne.s32.totalorder %s1504_s1, %s1053_s22  ;;  %p1060_p13 = scmp.lt.u32.totalorder %s1053_s22, %s1504_s1 }
  0x57   : > { %p1055_p5 = pneg %p1523_p11 }
  0x59   : > { %p1056_p8 = pnand %p1055_p5, %p1054_p9 }
  0x5b   : > { %p1057_p10 = pneg %p1056_p8 }
  0x5d   : > { %p1062_p1 = pnand %p1060_p13, %p1057_p10 }
  0x5f   : > { %1065 = shalt.err (!%p1062_p1)
}
  0x60   : > { %s1066_s6 = scalar_lea.vmem %s1337_s13, 64  ;;  %p1074_p3 = scmp.lt.s32.totalorder %s1337_s13, %s1337_s13 }
  0x61   : > { %p1067_p7 = scmp.ne.s32.totalorder %s1337_s13, %s1066_s6  ;;  %p1075_p2 = scmp.lt.s32.totalorder %s1066_s6, %s1066_s6 }
  0x63   : > { %p1069_p4 = pnand %p1067_p7, %p1055_p5  ;;  %p1076_p6 = por %p1075_p2, %p1074_p3 }
  0x65   : > { %p1070_p0 = pneg %p1069_p4 }
  0x67   : > { %p1077_p12 = pnand %p1076_p6, %p1070_p0 }
  0x69   : > { %1080 = shalt.err (!%p1077_p12)
}
  0x6a   : > { %915 = dma.hbm_to_vmem [thread:$0]  (!%p1523_p11), %s1504_s1, 64, %s1337_s13, [#allocation8]  }
  0x6b   : > { %p1524_p9 = scmp.ne.s32.totalorder %s1520_s11, 0 }
  0x6c   : > { %s244_s24 = sand.u32 (!%p1524_p9), 1, %s1299_s29   ;;  %s1391_s26 = sand.u32 (!%p1524_p9), 1, %s1155_s16  }
  0x6d   : > { %242 = sbr.rel (%p1524_p9) target bundleno = 641 (0x281), region = 36  ;;  %s767_s12 = sshll.u32 (!%p1524_p9), %s1391_s26, 1 }
  0x6e   : > { %s245_s14 = scalar_lea.sflag (!%p1524_p9), [#allocation5], %s244_s24  ;;  %s1394_s0 = scalar_lea.vmem (!%p1524_p9), [#allocation4], %s767_s12 }
  0x6f   : > { %p1525_p5 = scmp.ne.s32.totalorder (!%p1524_p9), %s1517_s7, 0 }
  0x74   : > { %1134 = dma.done.wait (%p1525_p5), %s245_s14, 32  }
  0x75   : > { %1136 = vsyncadd (%p1525_p5), %s245_s14, 4294967264  ;;  %p1526_p11 = scmp.eq.s32.totalorder %s1299_s29, 0 }
  0x77   : > { %1138 = dma.done.wait (%p1526_p11), [#allocation8], 64   ;;  %p1527_p8 = pmov %p1526_p11 }
  0x78   : > { %s769_s11 = sshll.u32 %s1391_s26, 2 }
  0x79   : > { %1140 = vsyncadd (%p1527_p8), [#allocation8], 4294967232  ;;  %s261_s13 = scalar_lea.vmem [#allocation9], %s769_s11 }
  0x7a   : > { %1142 = dma.done.wait (%p1525_p5), %s245_s14, 64  }
  0x7b   : > { %1144 = vsyncadd (%p1525_p5), %s245_s14, 4294967232  ;;  %v308_v0 = vlaneseq  ;;  %p295_p10 = scmp.lt.s32.totalorder %s1163_s18, 1  ;;  %v1176_v1 = vmov 0.0|0.0   ;;  %v1177_v2 = vmov 0.0   ;;  %vm1178_vm0 = vmmov 0   ;;  %s770_s23 = sshll.u32 %s1391_s26, 3 }
  0x7c   : > { %876 = vmatprep.subr.bf16.mxu0 %v1176_v1  ;;  %871 = vmatprep.subr.mxu1 %v1177_v2  ;;  %v377_v9 = vld [vmem:[#allocation7] sm:$0xf]  ;;  %v379_v10 = vld [vmem:[%s261_s13] sm:$0xf]  ;;  %v772_v11 = vld [vmem:[%s1394_s0] ss:$0 sm:$0xff] }
  0x7d   : > { %v1413_v3 = vshrl.u32 %v308_v0, 7  ;;  %868 = vmatprep.mubr.msk.f32.mxu0 %vm1178_vm0, %v1177_v2  ;;  %873 = vmatprep.mubr.msk.f32.mxu1 %vm1178_vm0, %v1177_v2  ;;  %s296_s29 = scalar_select %p295_p10, %s1163_s18, 1  ;;  %378 = vst [vmem:[#allocation2] sm:$0xf] %v377_v9  ;;  %380 = vst [vmem:[#allocation2 + $0x4] sm:$0xf] %v379_v10 }
  0x7e   : > { %v805_v12 = vld [vmem:[%s1394_s0 + $0x1] ss:$0 sm:$0xff]  ;;  %v1179_v13 = vmov 1.0|1.0   ;;  %vm467_vm7 = vcmask 64512   ;;  %v1180_v17 = vmov 1.0  }
  0x7f   : > { %v310_v4 = vadd.s32 8, %v1413_v3  ;;  %v311_v5 = vadd.s32 16, %v1413_v3  ;;  %v312_v6 = vadd.s32 24, %v1413_v3  ;;  %s771_s7 = sshll.u32 %s296_s29, 2  ;;  %v313_v7 = vadd.s32 32, %v1413_v3  ;;  %s294_s9 = scalar_lea.vmem [#allocation10], %s770_s23 }
  0x80   : > { %v314_v8 = vadd.s32 40, %v1413_v3  ;;  %vm329_vm1 = vcmp.eq.s32.totalorder %v1413_v3, %v772_v11  ;;  %s298_s22 = scalar_lea.vmem %s1506_s3, %s771_s7  ;;  %v315_v14 = vadd.s32 48, %v1413_v3  ;;  %v316_v16 = vadd.s32 56, %v1413_v3  ;;  %s634_s25 = sshll.u32 %s294_s9, 4  ;;  %s1456_s25 = int_to_ptr.vmem [resolvable:$true] %s634_s25 }
  0x81   : > { %vm330_vm2 = vcmp.eq.s32.totalorder %v310_v4, %v772_v11  ;;  %vm331_vm3 = vcmp.eq.s32.totalorder %v311_v5, %v772_v11  ;;  %vm332_vm4 = vcmp.eq.s32.totalorder %v312_v6, %v772_v11  ;;  %v466_v15 = vld [vmem:[%s298_s22] sm:$0xf]  ;;  %vm333_vm8 = vcmp.eq.s32.totalorder %v313_v7, %v772_v11  ;;  %s814_s6 = sshll.u32 %s1163_s18, 7  ;;  %s621_s0 = scalar_lea.sflag [#allocation6], %s1391_s26 }
  0x82   : > { %vm877_vm5 = vmpackc.low %vm330_vm2, %vm329_vm1  ;;  %vm334_vm9 = vcmp.eq.s32.totalorder %v314_v8, %v772_v11  ;;  %vm463_vm10 = vcmp.eq.s32.totalorder %v1413_v3, %v805_v12  ;;  %vm335_vm12 = vcmp.eq.s32.totalorder %v315_v14, %v772_v11  ;;  %vm336_vm13 = vcmp.eq.s32.totalorder %v316_v16, %v772_v11  ;;  %s1454_s14 = scalar_lea.hbm %s1507_s4, %s814_s6  ;;  %s1081_s11 = scalar_lea.vmem %s1456_s25, 128 }
  0x83   : > { %878 = vmatpush3.bf16.msk.msra.mxu0 %vm877_vm5, %v1179_v13  ;;  %vm880_vm6 = vmpackc.low %vm332_vm4, %vm331_vm3  ;;  %872 = vmatpush3.msk.msra.mxu1 %vm463_vm10, %v1180_v17  ;;  %v317_v18 = vadd.s32 64, %v1413_v3  ;;  %v318_v19 = vadd.s32 72, %v1413_v3  ;;  %v319_v20 = vadd.s32 80, %v1413_v3  ;;  %v320_v21 = vadd.s32 88, %v1413_v3  ;;  %p1082_p13 = scmp.ne.s32.totalorder %s1456_s25, %s1081_s11  ;;  %p1528_p1 = scmp.ne.s32.totalorder %s1518_s5, 0 }
  0x84   : > { %879 = vmatprep.subr.bf16.mxu0 %v1176_v1  ;;  %874 = vmatmul.mubr.msk.f32.vlgmr.msra.gmra.mrb[0].mxu1 %vm467_vm7, %v466_v15  ;;  %vm883_vm11 = vmpackc.low %vm334_vm9, %vm333_vm8  ;;  %v321_v22 = vadd.s32 96, %v1413_v3  ;;  %v322_v23 = vadd.s32 104, %v1413_v3  ;;  %v323_v24 = vadd.s32 112, %v1413_v3  ;;  %v324_v25 = vadd.s32 120, %v1413_v3  ;;  %v382_v26 = vld [vmem:[#allocation2] sm:$0xff]  ;;  %s1181_s18 = smov [#allocation10]  }
  0x85   : > { %vm886_vm14 = vmpackc.low %vm336_vm13, %vm335_vm12  ;;  %vm337_vm15 = vcmp.eq.s32.totalorder %v317_v18, %v772_v11  ;;  %vm338_vm0 = vcmp.eq.s32.totalorder %v318_v19, %v772_v11  ;;  %vm339_vm2 = vcmp.eq.s32.totalorder %v319_v20, %v772_v11  ;;  %vm340_vm3 = vcmp.eq.s32.totalorder %v320_v21, %v772_v11  ;;  %p1083_p7 = pnand %p1082_p13, %p1528_p1  ;;  %s1085_s13 = sshll.u32 %s1181_s18, 4  ;;  %s1086_s13 = int_to_ptr.vmem [resolvable:$false] %s1085_s13 }
  0x86   : > { %vm889_vm1 = vmpackc.low %vm338_vm0, %vm337_vm15  ;;  %vm341_vm5 = vcmp.eq.s32.totalorder %v321_v22, %v772_v11  ;;  %vm343_vm8 = vcmp.eq.s32.totalorder %v323_v24, %v772_v11  ;;  %vm344_vm9 = vcmp.eq.s32.totalorder %v324_v25, %v772_v11  ;;  %v557_v62 = vand.u32 127, %v308_v0  ;;  %s1087_s29 = scalar_lea.vmem %s1086_s13, 256  ;;  %p1088_p0 = scmp.lt.s32.totalorder %s1456_s25, %s1086_s13 }
  0x87   : > { %881 = vmatpush3.bf16.msk.msra.mxu0 %vm880_vm6, %v1179_v13  ;;  %vm892_vm4 = vmpackc.low %vm340_vm3, %vm339_vm2  ;;  %vm342_vm6 = vcmp.eq.s32.totalorder %v322_v23, %v772_v11  ;;  %vm606_vm15 = vcmask 1040384   ;;  %p1084_p4 = pneg %p1083_p7  ;;  %p1089_p3 = scmp.lt.s32.totalorder %s1087_s29, %s1081_s11 }
  0x88   : > { %882 = vmatprep.subr.bf16.mxu0 %v1176_v1  ;;  %vm895_vm7 = vmpackc.low %vm342_vm6, %vm341_vm5 }
  0x89   : > { %vm898_vm10 = vmpackc.low %vm344_vm9, %vm343_vm8  ;;  %p1090_p2 = por %p1089_p3, %p1088_p0 }
  0x8b   : > { %884 = vmatpush3.bf16.msk.msra.mxu0 %vm883_vm11, %v1179_v13  ;;  %p1091_p6 = pnand %p1090_p2, %p1084_p4 }
  0x8c   : > { %885 = vmatprep.subr.bf16.mxu0 %v1176_v1 }
  0x8f   : > { %887 = vmatpush3.bf16.msk.msra.mxu0 %vm886_vm14, %v1179_v13  ;;  %vm558_vm14 = vcmp.lt.s32.totalorder %v557_v62, 64 }
  0x90   : > { %888 = vmatprep.subr.bf16.mxu0 %v1176_v1  ;;  %v809_v7 = vsel %vm558_vm14, 1.0, %v1177_v2 }
  0x93   : > { %890 = vmatpush3.bf16.msk.msra.mxu0 %vm889_vm1, %v1179_v13 }
  0x94   : > { %891 = vmatprep.subr.bf16.mxu0 %v1176_v1 }
  0x97   : > { %893 = vmatpush3.bf16.msk.msra.mxu0 %vm892_vm4, %v1179_v13 }
  0x98   : > { %894 = vmatprep.subr.bf16.mxu0 %v1176_v1 }
  0x9b   : > { %896 = vmatpush3.bf16.msk.msra.mxu0 %vm895_vm7, %v1179_v13 }
  0x9c   : > { %897 = vmatprep.subr.bf16.mxu0 %v1176_v1 }
  0x9f   : > { %899 = vmatpush3.bf16.msk.msra.mxu0 %vm898_vm10, %v1179_v13 }
  0xa2   : > { %869 = vmatmul.mubr.f32.vlgmr.msra.gmra.mrb[0].mxu0 %v382_v26 }
 0x157   : > { %v537_v27 = vpop.f32.mrb[0].mxu1 }
 0x158   : > { %v875_v28 = vpop.f32.mrb[1].mxu1 }
 0x175   : > { %v449_v29 = vpop.f32.mrb[0].mxu0 }
 0x176   : > { %v542_v30 = vsub.f32 %v537_v27, %v449_v29  ;;  %v544_v31 = vrot.slane %v449_v29, 3  ;;  %v548_v32 = vrot.slane %v449_v29, 1  ;;  %985 = vrcp.f32 %v449_v29  ;;  %v870_v33 = vpop.f32.mrb[1].mxu0 }
 0x178   : > { %987 = vrcp.f32 %v544_v31 }
 0x179   : > { %989 = vrcp.f32 %v548_v32 }
 0x180   : > { %v986_v34 = vpop.eup %985 }
 0x181   : > { %v553_v35 = vmul.f32 %v986_v34, %v537_v27 }
 0x182   : > { %v988_v36 = vpop.eup %987 }
 0x183   : > { %v990_v37 = vpop.eup %989  ;;  %v547_v38 = vmul.f32 %v988_v36, %v542_v30  ;;  %991 = vlog2.f32 %v553_v35 }
 0x184   : > { %v551_v39 = vmul.f32 %v990_v37, %v542_v30 }
 0x185   : > { %v562_v40 = vrot.slane %v547_v38, 4 }
 0x186   : > { %v572_v41 = vrot.slane %v551_v39, 4 }
 0x187   : > { %v564_v42 = vsub.f32 %v449_v29, %v562_v40 }
 0x188   : > { %v574_v43 = vsub.f32 %v449_v29, %v572_v41 }
 0x189   : > { %v565_v44 = vand.u32 2147483647, %v564_v42  ;;  %v567_v45 = vmul.f32 0.5, %v564_v42 }
 0x18a   : > { %v575_v46 = vand.u32 2147483647, %v574_v43  ;;  %v577_v47 = vmul.f32 0.5, %v574_v43 }
 0x18b   : > { %v568_v48 = vmul.f32 %v567_v45, %v564_v42  ;;  %v810_v49 = vadd.f32 -0.5, %v565_v44  ;;  %vm566_vm12 = vcmp.lt.f32.partialorder %v565_v44, 1.0 }
 0x18c   : > { %v578_v50 = vmul.f32 %v577_v47, %v574_v43  ;;  %v811_v51 = vadd.f32 -0.5, %v575_v46  ;;  %vm576_vm11 = vcmp.lt.f32.partialorder %v575_v46, 1.0 }
 0x18d   : > { %v992_v52 = vpop.eup %991  ;;  %v570_v57 = vsel %vm566_vm12, %v568_v48, %v810_v49 }
 0x18e   : > { %v555_v53 = vmul.f32 0.6931472, %v992_v52  ;;  %v580_v54 = vsel %vm576_vm11, %v578_v50, %v811_v51 }
 0x18f   : > { %v582_v55 = vrot.slane %v580_v54, 1 }
 0x190   : > { %v586_v56 = vrot.slane %v555_v53, 4 }
 0x191   : > { %v584_v58 = vadd.f32 %v582_v55, %v570_v57 }
 0x192   : > { %v588_v59 = vsub.f32 %v449_v29, %v586_v56 }
 0x194   : > { %v591_v60 = vmul.f32 0.5, %v588_v59  ;;  %v589_v61 = vand.u32 2147483647, %v588_v59 }
 0x196   : > { %vm590_vm13 = vcmp.lt.f32.partialorder %v589_v61, 1.0  ;;  %v592_v63 = vmul.f32 %v591_v60, %v588_v59  ;;  %v812_v1 = vadd.f32 -0.5, %v589_v61 }
 0x198   : > { %v594_v3 = vsel %vm590_vm13, %v592_v63, %v812_v1 }
 0x199   : > { %v596_v4 = vrot.slane %v594_v3, 2  ;;  %v599_v6 = vrot.slane %v594_v3, 3 }
 0x19b   : > { %v598_v5 = vadd.f32 %v596_v4, %v584_v58 }
 0x19d   : > { %v601_v8 = vadd.f32 %v599_v6, %v598_v5 }
 0x19f   : > { %v602_v9 = vmul.f32 %v809_v7, %v601_v8 }
 0x1a1   : > { %v604_v10 = vrot.slane %v602_v9, 4 }
 0x1a3   : > { %v607_v11 = vsel %vm606_vm15, %v604_v10, 0.0 }
 0x1a4   : > { %608 = vadd.xlane.f32.xlu0 %v607_v11 }
 0x231   : > { %v609_v12 = vpop.xlane.xlu0 %608 }
 0x232   : > { %v610_v0 = vrot.slane %v609_v12, 4 }
 0x234   : > { %v611_v13 = vadd.f32 %v610_v0, %v609_v12 }
 0x236   : > { %v612_v14 = vrot.slane %v611_v13, 2 }
 0x238   : > { %v613_v15 = vadd.f32 %v612_v14, %v611_v13 }
 0x23a   : > { %v614_v16 = vrot.slane %v613_v15, 1 }
 0x23c   : > { %v615_v17 = vadd.f32 %v614_v16, %v613_v15 }
 0x23e   : > { %900 = vpush %v615_v17 }
 0x26f   : > { %s901_s2 = spop %900 }
 0x270   : > { %s617_s10 = smul.f32 0.00390625, %s901_s2 }
 0x272   : > { %v618_v2 = vstv %s617_s10 }
 0x273   : > { %619 = vst [vmem:[%s294_s9] sm:$0xff] %v618_v2 }
 0x274   : > { %1094 = shalt.err (!%p1091_p6)
}
 0x275   : > { %s1095_s26 = scalar_lea.hbm %s1454_s14, 128  ;;  %s1099_s30 = scalar_lea.hbm %s1507_s4, 256 }
 0x276   : > { %p1096_p12 = scmp.ne.s32.totalorder %s1454_s14, %s1095_s26  ;;  %p1100_p11 = scmp.lt.u32.totalorder %s1454_s14, %s1507_s4 }
 0x277   : > { %p1101_p8 = scmp.lt.u32.totalorder %s1099_s30, %s1095_s26  ;;  %p1103_p13 = scmp.lt.u32.totalorder %s1095_s26, %s1454_s14 }
 0x278   : > { %p1097_p9 = pnand %p1096_p12, %p1528_p1 }
 0x279   : > { %p1102_p10 = por %p1101_p8, %p1100_p11 }
 0x27a   : > { %p1098_p5 = pneg %p1097_p9 }
 0x27b   : > { %p1104_p7 = por %p1103_p13, %p1102_p10 }
 0x27d   : > { %p1105_p4 = pnand %p1104_p7, %p1098_p5 }
 0x27f   : > { %1108 = shalt.err (!%p1105_p4)
}
 0x280   : > { %910 = dma.vmem_to_hbm [thread:$0]  (%p1528_p1), %s1456_s25, 128, %s1454_s14, %s621_s0  }
 0x281 PF: > { %s646_s9 = sand.u32 1, %s1151_s15   ;;  %p1529_p0 = scmp.ne.s32.totalorder %s1519_s8, 0 }
 0x282   : > { %p1530_p3 = scmp.ge.s32.totalorder %s1171_s20, 2  ;;  %s647_s6 = scalar_lea.sflag [#allocation6], %s646_s9 }
 0x284   : > { %p924_p2 = pnand %p1530_p3, %p1529_p0 }
 0x286   : > { %1146 = dma.done.wait (!%p924_p2), %s647_s6, 128  }
 0x287   : > { %1148 = vsyncadd (!%p924_p2), %s647_s6, 4294967168  ;;  %s21_s20 = sadd.s32 1, %s1171_s20   ;;  %s1531_s15 = smov %s1155_s16 }
 0x288   : > { %p18_p6 = scmp.ge.s32.totalorder %s21_s20, 4   ;;  %s1532_s16 = smov %s1159_s17 }
 0x289   : > { %s1533_s17 = smov %s1255_s27  ;;  %s1534_s18 = smov %s1167_s19 }
 0x28a   : > { %s1535_s19 = smov %s1537_s21  ;;  %20 = sbr.rel (!%p18_p6) target bundleno = 10 (0xa), region = 108 }
 0x291   :  { %652 = vsyncpa [#allocation5], 1 }
 0x292   :  { %654 = vsyncpa [#allocation5 + $0x1], 1 }
 0x293   :  { %655 = vsyncpa [#allocation8], 1 }
 0x294   :  { %656 = vsyncpa [#allocation6], 1 }
 0x295   :  { %658 = vsyncpa [#allocation6 + $0x1], 1 }

</bundles_post_ra>
